<compile_context>
chip_gen: v7x
topology: tpu7x:2x2x1
jax: 0.10.0
libtpu: 0.0.40
codegen_flags: <defaults>
</compile_context>

<pallas_src>
import functools

import jax
import jax.numpy as jnp
from jax import lax
from jax.experimental import pallas as pl
from jax.experimental.pallas import tpu as pltpu

LN_EPS_BLOCK = 1e-5   # nn.LayerNorm default eps (timm Block with default norm)
LN_EPS_FINAL = 1e-5   # encoder's final nn.LayerNorm
NEG_INF = -1e30       # additive key-mask; safe because scores stay f32


# ----------------------------- small helpers ---------------------------------


def _layernorm(x, w, b, eps):
    mu = jnp.mean(x, axis=-1, keepdims=True)
    var = jnp.mean(jnp.square(x - mu), axis=-1, keepdims=True)
    return (x - mu) * lax.rsqrt(var + eps) * w + b


def _softmax_lastdim(s, *, approx):
    s = s - jnp.max(s, axis=-1, keepdims=True)
    p = jnp.exp(s)
    denom = jnp.sum(p, axis=-1, keepdims=True)
    if approx:
        return p * pl.reciprocal(denom, approx=True)
    return p / denom


def _key_mask_bias(tp, n_real, ndim):
    """0 for real key columns, NEG_INF for padded ones (None if no padding)."""
    if n_real >= tp:
        return None
    kidx = lax.broadcasted_iota(jnp.int32, (1,) * (ndim - 1) + (tp,), ndim - 1)
    return jnp.where(kidx < n_real, 0.0, NEG_INF).astype(jnp.float32)


def _largest_divisor_leq(n, cap):
    cap = max(1, min(n, cap))
    for d in range(cap, 0, -1):
        if n % d == 0:
            return d
    return 1


# --------------------- hardware queries (generation aware) -------------------


def _vmem_capacity_bytes():
    try:
        v = int(pltpu.get_tpu_info().vmem_capacity_bytes)
        if v > 0:
            return v
    except Exception:
        pass
    return 64 * 1024 * 1024           # conservative default (v7x per-core VMEM)


def _num_tensorcores():
    try:
        info = pltpu.get_tpu_info()
        for name in ("num_cores", "core_count", "num_tensorcores"):
            v = getattr(info, name, None)
            if isinstance(v, int) and v > 0:
                return v
    except Exception:
        pass
    try:
        v = getattr(jax.devices()[0], "num_cores", None)
        if isinstance(v, int) and v > 0:
            return v
    except Exception:
        pass
    return 1


def _pick_batch_tile(B, Tp, C, num_heads):
    """Largest batch tile whose working set fits the detected VMEM budget."""
    vmem = _vmem_capacity_bytes()
    budget = int(vmem * 0.75)
    # per-layer weights (bf16), double-buffered by the BlockSpec pipeline
    weight_bytes = 2 * 2 * (12 * C * C)
    # bytes per activation row (M = Bt*Tp): bf16 input block (x2 buffers),
    # f32 residual/out block (x2), bf16 qkv, f32 MLP hidden, misc transients.
    per_row = (2 * C * 2) + (2 * C * 4) + (3 * C * 2) + (4 * C * 4) + (6 * C * 4)
    per_row += num_heads * Tp * 4          # f32 attention scores
    avail = max(budget - weight_bytes, per_row * Tp)
    max_m = avail // per_row
    # generation-dependent cap: small VMEM (v7x 64 MiB) -> keep M modest;
    # large VMEM (v5e/v6e 128 MiB) -> larger M to amortize weight streaming.
    max_m = min(max_m, 1024 if vmem <= 80 * 2**20 else 4096)
    max_bt = max(1, int(max_m // max(Tp, 1)))
    divisors = [d for d in range(1, B + 1) if B % d == 0 and d <= max_bt]
    best = max(divisors)
    n_tc = _num_tensorcores()
    if n_tc > 1:
        good = [d for d in divisors if (B // d) % n_tc == 0]
        if good:
            best = max(good)               # keep parallel axis >= #TensorCores
    return best


# ----------------------------- attention cores --------------------------------


def _attention_head_batched(qkv, Bt, Tp, H, hd, n_real, scale, *, approx=True):
    """Head-batched MHA core: qkv (M, 3C) bf16 -> concat-head output (M, C) f32."""
    C = H * hd
    M = Bt * Tp
    q = qkv[:, 0:C].reshape(Bt, Tp, H, hd)
    k = qkv[:, C:2 * C].reshape(Bt, Tp, H, hd)
    v = qkv[:, 2 * C:3 * C].reshape(Bt, Tp, H, hd)
    s = jnp.einsum('bqhd,bkhd->bhqk', q, k,
                   preferred_element_type=jnp.float32) * scale
    bias = _key_mask_bias(Tp, n_real, 4)
    if bias is not None:
        s = s + bias
    p = _softmax_lastdim(s, approx=approx).astype(jnp.bfloat16)
    o = jnp.einsum('bhqk,bkhd->bqhd', p, v, preferred_element_type=jnp.float32)
    return o.reshape(M, C)


def _attention_per_head(qkv, proj_w, Bt, Tp, H, hd, n_real, scale, *, approx=True):
    """Fallback MHA: static head loop with the output projection folded per head
    (no lane-axis concatenate; only one (M, C) f32 accumulator stays live)."""
    C = H * hd
    M = Bt * Tp
    bias = _key_mask_bias(Tp, n_real, 3)
    y = jnp.zeros((M, C), jnp.float32)
    for h in range(H):
        qh = qkv[:, h * hd:(h + 1) * hd].reshape(Bt, Tp, hd)
        kh = qkv[:, C + h * hd:C + (h + 1) * hd].reshape(Bt, Tp, hd)
        vh = qkv[:, 2 * C + h * hd:2 * C + (h + 1) * hd].reshape(Bt, Tp, hd)
        s = jnp.einsum('bqd,bkd->bqk', qh, kh,
                       preferred_element_type=jnp.float32) * scale
        if bias is not None:
            s = s + bias
        p = _softmax_lastdim(s, approx=approx).astype(jnp.bfloat16)
        oh = jnp.einsum('bqk,bkd->bqd', p, vh, preferred_element_type=jnp.float32)
        y = y + jnp.dot(oh.reshape(M, hd).astype(jnp.bfloat16),
                        proj_w[h * hd:(h + 1) * hd, :],
                        preferred_element_type=jnp.float32)
    return y


@functools.lru_cache(maxsize=None)
def _head_batched_supported(Bt, Tp, H, hd, n_real):
    """Probe (once per shape) whether Mosaic lowers the head-batched attention
    (multi-batch-dim dot_general + implied relayouts) and matches plain JAX."""
    C = H * hd
    scale = float(hd) ** -0.5

    def probe_kernel(qkv_ref, o_ref):
        o_ref[...] = _attention_head_batched(
            qkv_ref[...], Bt, Tp, H, hd, n_real, scale)

    try:
        qkv = (jax.random.normal(jax.random.PRNGKey(42), (Bt * Tp, 3 * C),
                                 jnp.float32) * 0.5).astype(jnp.bfloat16)
        out = pl.pallas_call(
            probe_kernel,
            out_shape=jax.ShapeDtypeStruct((Bt * Tp, C), jnp.float32),
        )(qkv)
        ref = _attention_head_batched(qkv, Bt, Tp, H, hd, n_real, scale,
                                      approx=False)
        jax.block_until_ready((out, ref))
        return bool(jnp.allclose(out, ref, atol=3e-2, rtol=3e-2))
    except Exception:
        return False


# ----------------------------- Pallas kernels --------------------------------


def patchify_kernel(x_ref, w_ref, b_ref, pos_ref, o_ref):
    """Per-patch linear projection (Conv1d k=s=patch) + pos-embedding add."""
    Bt, Tt, K = x_ref.shape
    C = w_ref.shape[1]
    x = x_ref[...].reshape(Bt * Tt, K)
    y = jnp.dot(x.astype(jnp.bfloat16), w_ref[...],
                preferred_element_type=jnp.float32) + b_ref[...]
    y = y.reshape(Bt, Tt, C) + pos_ref[...]
    o_ref[...] = y.astype(o_ref.dtype)


def fused_blocks_kernel(x_ref,
                        ln1w_ref, ln1b_ref, qkvw_ref, qkvb_ref,
                        projw_ref, projb_ref, ln2w_ref, ln2b_ref,
                        fc1w_ref, fc1b_ref, fc2w_ref, fc2b_ref,
                        lnfw_ref, lnfb_ref,
                        o_ref, *, num_heads, n_real_tokens, head_batched):
    """One pre-norm ViT block per grid step along the layer axis.

    o_ref (same block index for every layer step) holds the f32 residual
    stream, VMEM-resident across all layers; it is overwritten with the final
    LayerNorm output on the last step.
    """
    l = pl.program_id(1)
    Bt, Tp, C = x_ref.shape
    M = Bt * Tp
    H = num_heads
    hd = C // H
    scale = float(hd) ** -0.5

    @pl.when(l == 0)
    def _():
        o_ref[...] = x_ref[...].astype(jnp.float32)

    x = o_ref[...].reshape(M, C)

    # ---- multi-head self-attention (batch folded into the MXU M dim) ----
    xn = _layernorm(x, ln1w_ref[0], ln1b_ref[0], LN_EPS_BLOCK)
    qkv = (jnp.dot(xn.astype(jnp.bfloat16), qkvw_ref[0],
                   preferred_element_type=jnp.float32)
           + qkvb_ref[0]).astype(jnp.bfloat16)            # (M, 3C), short f32 life

    if head_batched:
        attn = _attention_head_batched(qkv, Bt, Tp, H, hd, n_real_tokens, scale)
        attn = jnp.dot(attn.astype(jnp.bfloat16), projw_ref[0],
                       preferred_element_type=jnp.float32)
    else:
        # TODO(synk): drop this fallback once multi-batch-dim dot_general /
        # head-major relayouts are guaranteed to lower in Mosaic.
        attn = _attention_per_head(qkv, projw_ref[0], Bt, Tp, H, hd,
                                   n_real_tokens, scale)
    x = x + attn + projb_ref[0]

    # ---- MLP ----
    xn2 = _layernorm(x, ln2w_ref[0], ln2b_ref[0], LN_EPS_BLOCK)
    h1 = jnp.dot(xn2.astype(jnp.bfloat16), fc1w_ref[0],
                 preferred_element_type=jnp.float32) + fc1b_ref[0]
    # TODO(synk): timm uses exact (erf) GELU; tanh approximation kept for
    # robust Mosaic lowering -- numerically extremely close.
    h1 = jax.nn.gelu(h1, approximate=True).astype(jnp.bfloat16)
    x = x + jnp.dot(h1, fc2w_ref[0],
                    preferred_element_type=jnp.float32) + fc2b_ref[0]

    is_last = l == pl.num_programs(1) - 1

    @pl.when(jnp.logical_not(is_last))
    def _():
        o_ref[...] = x.reshape(Bt, Tp, C)

    @pl.when(is_last)
    def _():
        y = _layernorm(x, lnfw_ref[...], lnfb_ref[...], LN_EPS_FINAL)
        o_ref[...] = y.reshape(Bt, Tp, C)


# ----------------------------- Pallas wrappers -------------------------------


def patchify(x, w, b, pos):
    """x: (B, Tvis, K); pos: (B, Tvis, C) pre-gathered rows. Returns bf16 tokens."""
    B, Tt, K = x.shape
    C = w.shape[1]
    bt = _largest_divisor_leq(B, max(1, 2048 // max(Tt, 1)))
    return pl.pallas_call(
        patchify_kernel,
        out_shape=jax.ShapeDtypeStruct((B, Tt, C), jnp.bfloat16),
        grid=(B // bt,),
        in_specs=[pl.BlockSpec((bt, Tt, K), lambda i: (i, 0, 0)),
                  pl.BlockSpec((K, C), lambda i: (0, 0)),
                  pl.BlockSpec((1, C), lambda i: (0, 0)),
                  pl.BlockSpec((bt, Tt, C), lambda i: (i, 0, 0))],
        out_specs=pl.BlockSpec((bt, Tt, C), lambda i: (i, 0, 0)),
        compiler_params=pltpu.CompilerParams(
            dimension_semantics=("parallel",)),
    )(x, w, b, pos)


def transformer_stack(x, params, *, num_heads, n_real_tokens):
    """All ViT blocks + final LayerNorm in a single fused pallas_call."""
    B, Tp, C = x.shape
    L = params['qkv_w'].shape[0]
    H = num_heads
    hd = C // H
    Bt = _pick_batch_tile(B, Tp, C, H)
    nB = B // Bt
    head_batched = _head_batched_supported(Bt, Tp, H, hd, n_real_tokens)

    stacked_names = ('ln1_w', 'ln1_b', 'qkv_w', 'qkv_b', 'proj_w', 'proj_b',
                     'ln2_w', 'ln2_b', 'fc1_w', 'fc1_b', 'fc2_w', 'fc2_b')
    stacked = [params[k] for k in stacked_names]          # each (L, ...)
    final = [params['lnf_w'], params['lnf_b']]            # (1, C) each

    w_specs = [pl.BlockSpec((1,) + w.shape[1:], lambda b, l: (l, 0, 0))
               for w in stacked]
    f_specs = [pl.BlockSpec(w.shape, lambda b, l: (0, 0)) for w in final]

    vmem_limit = min(int(_vmem_capacity_bytes() * 0.75), 100 * 2**20)

    def _run(use_head_batched):
        return pl.pallas_call(
            functools.partial(fused_blocks_kernel, num_heads=H,
                              n_real_tokens=n_real_tokens,
                              head_batched=use_head_batched),
            out_shape=jax.ShapeDtypeStruct((B, Tp, C), jnp.float32),
            grid=(nB, L),
            in_specs=[pl.BlockSpec((Bt, Tp, C), lambda b, l: (b, 0, 0))]
                     + w_specs + f_specs,
            out_specs=pl.BlockSpec((Bt, Tp, C), lambda b, l: (b, 0, 0)),
            compiler_params=pltpu.CompilerParams(
                dimension_semantics=("parallel", "arbitrary"),
                vmem_limit_bytes=vmem_limit),
        )(x, *stacked, *final)

    if head_batched:
        try:
            return _run(True)
        except Exception:
            return _run(False)        # belt-and-suspenders fallback
    return _run(False)


# ------------------------------ parameters -----------------------------------


def init_params(key, sequ_len, n_channel, patch_size, emb_dim, num_layer):
    T = sequ_len // patch_size
    C = emb_dim
    K = n_channel * patch_size
    Hd = 4 * C
    keys = jax.random.split(key, 3 + 4 * num_layer)

    def nrm(k, shape, dtype=jnp.float32):
        return (jax.random.normal(k, shape, jnp.float32) * 0.02).astype(dtype)

    kq = keys[3:3 + num_layer]
    kp = keys[3 + num_layer:3 + 2 * num_layer]
    k1 = keys[3 + 2 * num_layer:3 + 3 * num_layer]
    k2 = keys[3 + 3 * num_layer:3 + 4 * num_layer]

    params = {
        'cls_token': nrm(keys[0], (1, 1, C)),
        'pos_embedding': nrm(keys[1], (T, C)),               # ref: (T, 1, C)
        'patch_w': nrm(keys[2], (K, C), jnp.bfloat16),       # Conv1d as linear
        'patch_b': jnp.zeros((1, C), jnp.float32),
        # per-layer weights stacked along a leading layer axis (bf16 matmuls);
        # layout is (in, out) -- transpose PyTorch (out, in) weights if loading.
        'ln1_w': jnp.ones((num_layer, 1, C), jnp.float32),
        'ln1_b': jnp.zeros((num_layer, 1, C), jnp.float32),
        'qkv_w': jnp.stack([nrm(k, (C, 3 * C), jnp.bfloat16) for k in kq]),
        'qkv_b': jnp.zeros((num_layer, 1, 3 * C), jnp.float32),
        'proj_w': jnp.stack([nrm(k, (C, C), jnp.bfloat16) for k in kp]),
        'proj_b': jnp.zeros((num_layer, 1, C), jnp.float32),
        'ln2_w': jnp.ones((num_layer, 1, C), jnp.float32),
        'ln2_b': jnp.zeros((num_layer, 1, C), jnp.float32),
        'fc1_w': jnp.stack([nrm(k, (C, Hd), jnp.bfloat16) for k in k1]),
        'fc1_b': jnp.zeros((num_layer, 1, Hd), jnp.float32),
        'fc2_w': jnp.stack([nrm(k, (Hd, C), jnp.bfloat16) for k in k2]),
        'fc2_b': jnp.zeros((num_layer, 1, C), jnp.float32),
        'lnf_w': jnp.ones((1, C), jnp.float32),
        'lnf_b': jnp.zeros((1, C), jnp.float32),
    }
    return params


# ------------------------------ forward pass ----------------------------------


def mae_encoder_forward(params, sequ, shuffle_key, *, num_heads, patch_size,
                        mask_ratio):
    """sequ: (B, n_channel, sequ_len). Returns (features (T',B,C), backward_indexes)."""
    B, n_channel, sequ_len = sequ.shape
    C = params['patch_w'].shape[1]
    T = sequ_len // patch_size
    K = n_channel * patch_size
    remain_T = int(T * (1 - mask_ratio))

    # ---- PatchShuffle indices (vmapped per-sample permutations) ----
    perm_keys = jax.random.split(shuffle_key, B)
    forward_indexes = jax.vmap(
        lambda k: jax.random.permutation(k, T))(perm_keys).astype(jnp.int32)  # (B, T)
    forward_indexes = jnp.transpose(forward_indexes, (1, 0))                  # (T, B)
    selected_forward = forward_indexes[:remain_T]                             # (rT, B)
    backward_indexes = jnp.argsort(selected_forward, axis=0).astype(jnp.int32)
    idx_bt = jnp.transpose(selected_forward, (1, 0))                          # (B, rT)

    # ---- gather the VISIBLE raw patches + their pos rows BEFORE patchify ----
    x4 = sequ.reshape(B, n_channel, T, patch_size)
    gidx = jnp.broadcast_to(idx_bt[:, None, :, None],
                            (B, n_channel, remain_T, patch_size))
    visible = jnp.take_along_axis(x4, gidx, axis=2)              # (B, nc, rT, p)
    x = jnp.transpose(visible, (0, 2, 1, 3)).reshape(B, remain_T, K)
    pos_sel = params['pos_embedding'][idx_bt]                    # (B, rT, C)

    # ---- patchify only visible tokens (Conv1d k=s=patch as a tiled matmul) ----
    patches = patchify(x, params['patch_w'], params['patch_b'], pos_sel)  # bf16

    # ---- prepend cls token, pad token axis to a sublane multiple ----
    cls = jnp.broadcast_to(params['cls_token'], (B, 1, C)).astype(jnp.bfloat16)
    tokens = jnp.concatenate([cls, patches], axis=1)             # (B, Tr, C)
    Tr = remain_T + 1
    Tp = ((Tr + 7) // 8) * 8
    if Tp != Tr:
        tokens = jnp.pad(tokens, ((0, 0), (0, Tp - Tr), (0, 0)))

    # ---- fused transformer (all layers + final LayerNorm, one pallas_call) ----
    feats = transformer_stack(tokens, params, num_heads=num_heads,
                              n_real_tokens=Tr)                  # (B, Tp, C) f32

    feats = feats[:, :Tr]                                        # drop padding
    features = jnp.transpose(feats, (1, 0, 2))                   # (T', B, C)
    return features, backward_indexes


# --------------------------------- main ----------------------------------------


if __name__ == "__main__":
    # small shapes consistent with the module
    sequ_len, n_channel, patch_size = 16, 4, 2
    emb_dim, num_layer, num_head = 32, 2, 4
    mask_ratio = 0.75
    B = 2
    T = sequ_len // patch_size                 # 8 patches
    remain_T = int(T * (1 - mask_ratio))       # 2 visible patches

    key = jax.random.PRNGKey(0)
    pkey, xkey, skey = jax.random.split(key, 3)
    params = init_params(pkey, sequ_len, n_channel, patch_size, emb_dim,
                         num_layer)
    sequ = jax.random.normal(xkey, (B, n_channel, sequ_len), jnp.float32)

    features, backward_indexes = mae_encoder_forward(
        params, sequ, skey, num_heads=num_head, patch_size=patch_size,
        mask_ratio=mask_ratio)
    jax.block_until_ready((features, backward_indexes))

    assert features.shape == (remain_T + 1, B, emb_dim), features.shape
    assert backward_indexes.shape == (remain_T, B), backward_indexes.shape
    assert bool(jnp.all(jnp.isfinite(features)))
    print("KERNEL_OK")
</pallas_src>

<mosaic_0001>
module attributes {stable_mosaic.version = 11 : i64} {
  func.func @patchify_kernel(%arg0: i32, %arg1: memref<2x2x8xf32, #tpu.memory_space<vmem>>, %arg2: memref<8x32xbf16, #tpu.memory_space<vmem>>, %arg3: memref<1x32xf32, #tpu.memory_space<vmem>>, %arg4: memref<2x2x32xf32, #tpu.memory_space<vmem>>, %arg5: memref<2x2x32xbf16, #tpu.memory_space<vmem>>) attributes {dimension_semantics = [#tpu.dimension_semantics<parallel>], iteration_bounds = array<i64: 1>, scalar_prefetch = 0 : i64, scratch_operands = 0 : i64, tpu.core_type = #tpu.core_type<tc>, window_params = [{transform_indices = @transform_0, window_bounds = array<i64: 2, 2, 8>}, {pipeline_mode = #tpu.pipeline_mode<synchronous>, transform_indices = @transform_1, window_bounds = array<i64: 8, 32>}, {pipeline_mode = #tpu.pipeline_mode<synchronous>, transform_indices = @transform_2, window_bounds = array<i64: 1, 32>}, {transform_indices = @transform_3, window_bounds = array<i64: 2, 2, 32>}, {transform_indices = @transform_4, window_bounds = array<i64: 2, 2, 32>}]} {
    %c0 = arith.constant 0 : index
    %c0_0 = arith.constant 0 : index
    %c0_1 = arith.constant 0 : index
    %0 = vector.load %arg1[%c0, %c0_0, %c0_1] : memref<2x2x8xf32, #tpu.memory_space<vmem>>, vector<2x2x8xf32>
    %1 = vector.shape_cast %0 : vector<2x2x8xf32> to vector<4x8xf32>
    %2 = arith.truncf %1 : vector<4x8xf32> to vector<4x8xbf16>
    %c0_2 = arith.constant 0 : index
    %c0_3 = arith.constant 0 : index
    %3 = vector.load %arg2[%c0_2, %c0_3] : memref<8x32xbf16, #tpu.memory_space<vmem>>, vector<8x32xbf16>
    %cst = arith.constant dense<0.000000e+00> : vector<4x32xf32>
    %4 = tpu.matmul %2, %3, %cst {dimension_numbers = #tpu.dot_dimension_numbers<[1], [0], [0], [1], [0, 0, 1, 1], [], []>} : vector<4x8xbf16>, vector<8x32xbf16>, vector<4x32xf32> -> vector<4x32xf32>
    %c0_4 = arith.constant 0 : index
    %c0_5 = arith.constant 0 : index
    %5 = vector.load %arg3[%c0_4, %c0_5] : memref<1x32xf32, #tpu.memory_space<vmem>>, vector<1x32xf32>
    %6 = vector.broadcast %5 : vector<1x32xf32> to vector<4x32xf32>
    %7 = arith.addf %4, %6 : vector<4x32xf32>
    %8 = vector.shape_cast %7 : vector<4x32xf32> to vector<2x2x32xf32>
    %c0_6 = arith.constant 0 : index
    %c0_7 = arith.constant 0 : index
    %c0_8 = arith.constant 0 : index
    %9 = vector.load %arg4[%c0_6, %c0_7, %c0_8] : memref<2x2x32xf32, #tpu.memory_space<vmem>>, vector<2x2x32xf32>
    %10 = arith.addf %8, %9 : vector<2x2x32xf32>
    %11 = arith.truncf %10 : vector<2x2x32xf32> to vector<2x2x32xbf16>
    %c0_9 = arith.constant 0 : index
    %c0_10 = arith.constant 0 : index
    %c0_11 = arith.constant 0 : index
    %12 = vector.load %arg5[%c0_9, %c0_10, %c0_11] : memref<2x2x32xbf16, #tpu.memory_space<vmem>>, vector<2x2x32xbf16>
    tpu.vector_store %arg5[%c0_9, %c0_10, %c0_11], %11 {strides = array<i32>} : memref<2x2x32xbf16, #tpu.memory_space<vmem>>, vector<2x2x32xbf16>,
    return
  }
  func.func @transform_0(%arg0: i32) -> (i32, i32, i32) {
    %c0_i32 = arith.constant 0 : i32
    %c0_i32_0 = arith.constant 0 : i32
    %c0_i32_1 = arith.constant 0 : i32
    return %arg0, %c0_i32, %c0_i32_0 : i32, i32, i32
  }
  func.func @transform_1(%arg0: i32) -> (i32, i32) {
    %c0_i32 = arith.constant 0 : i32
    %c0_i32_0 = arith.constant 0 : i32
    %c0_i32_1 = arith.constant 0 : i32
    return %c0_i32, %c0_i32_0 : i32, i32
  }
  func.func @transform_2(%arg0: i32) -> (i32, i32) {
    %c0_i32 = arith.constant 0 : i32
    %c0_i32_0 = arith.constant 0 : i32
    %c0_i32_1 = arith.constant 0 : i32
    return %c0_i32, %c0_i32_0 : i32, i32
  }
  func.func @transform_3(%arg0: i32) -> (i32, i32, i32) {
    %c0_i32 = arith.constant 0 : i32
    %c0_i32_0 = arith.constant 0 : i32
    %c0_i32_1 = arith.constant 0 : i32
    return %arg0, %c0_i32, %c0_i32_0 : i32, i32, i32
  }
  func.func @transform_4(%arg0: i32) -> (i32, i32, i32) {
    %c0_i32 = arith.constant 0 : i32
    %c0_i32_0 = arith.constant 0 : i32
    %c0_i32_1 = arith.constant 0 : i32
    return %arg0, %c0_i32, %c0_i32_0 : i32, i32, i32
  }
}

</mosaic_0001>

<bundles_post_ra>
// kernel: tpu_custom_call.1
= control target key start
LH: loop header
LB: loop body
LE: loop exit
PB: predicated region body
PF: predicated region fallthrough
CT: control target
= control target key end

     0   :  { %9 = vsyncpa [#allocation3], 0  ;;  %s325_s0 = inlined_call_operand.hbm [shape: f32[2,2,8], index: 0, kind: input, shape index: {}]   ;;  %s326_s1 = inlined_call_operand.hbm [shape: bf16[8,32], index: 1, kind: input, shape index: {}]   ;;  %s327_s2 = inlined_call_operand.vmem [shape: f32[1,32], index: 2, kind: input, shape index: {}]   ;;  %s328_s3 = inlined_call_operand.vmem [shape: f32[2,2,32], index: 3, kind: input, shape index: {}]   ;;  %s329_s4 = inlined_call_operand.hbm [shape: bf16[2,2,32], index: 4, kind: output, shape index: {}]  }
   0x1   :  { %10 = vsyncpa [#allocation6], 0 }
   0x2   :  { %11 = vsyncpa [#allocation4], 0  ;;  %s245_s15 = smov [#allocation2]   ;;  %s173_s19 = scalar_lea.hbm %s325_s0, 64 }
   0x3   :  { %s17_s16 = sshll.u32 %s245_s15, 4  ;;  %p174_p0 = scmp.ne.s32.totalorder %s325_s0, %s173_s19  ;;  %s18_s16 = int_to_ptr.vmem [resolvable:$true] %s17_s16 }
   0x4   :  { %p177_p1 = scmp.lt.u32.totalorder %s173_s19, %s325_s0 }
   0x6   :  { %p179_p2 = pnand %p177_p1, %p174_p0 }
   0x8   :  { %182 = shalt.err (!%p179_p2)
}
   0x9   :  { %s183_s24 = scalar_lea.vmem %s18_s16, 64  ;;  %p188_p4 = scmp.lt.s32.totalorder %s18_s16, %s18_s16 }
   0xa   :  { %p184_p3 = scmp.ne.s32.totalorder %s18_s16, %s183_s24  ;;  %p189_p5 = scmp.lt.s32.totalorder %s183_s24, %s183_s24 }
   0xc   :  { %p190_p6 = por %p189_p5, %p188_p4 }
   0xe   :  { %p191_p7 = pnand %p190_p6, %p184_p3 }
  0x10   :  { %194 = shalt.err (!%p191_p7)
}
  0x11   :  { %s246_s25 = smov 32   ;;  %s247_s26 = smov 2  }
  0x12   :  { %23 = dma.hbm_to_vmem [thread:$0]  %s325_s0, 64, %s18_s16, [#allocation3], %s246_s25, %s246_s25, %s247_s26  }
  0x13   :  { %s248_s29 = smov [#allocation5]   ;;  %s195_s7 = scalar_lea.hbm %s326_s1, 64 }
  0x14   :  { %s30_s30 = sshll.u32 %s248_s29, 4  ;;  %p196_p8 = scmp.ne.s32.totalorder %s326_s1, %s195_s7  ;;  %s31_s30 = int_to_ptr.vmem [resolvable:$true] %s30_s30 }
  0x15   :  { %p199_p9 = scmp.lt.u32.totalorder %s195_s7, %s326_s1 }
  0x17   :  { %p201_p10 = pnand %p199_p9, %p196_p8 }
  0x19   :  { %204 = shalt.err (!%p201_p10)
}
  0x1a   :  { %s205_s12 = scalar_lea.vmem %s31_s30, 64  ;;  %p210_p12 = scmp.lt.s32.totalorder %s31_s30, %s31_s30 }
  0x1b   :  { %p206_p11 = scmp.ne.s32.totalorder %s31_s30, %s205_s12  ;;  %p211_p13 = scmp.lt.s32.totalorder %s205_s12, %s205_s12 }
  0x1d   :  { %p212_p0 = por %p211_p13, %p210_p12 }
  0x1f   :  { %p213_p1 = pnand %p212_p0, %p206_p11 }
  0x21   :  { %216 = shalt.err (!%p213_p1)
}
  0x22   :  { %33 = dma.hbm_to_vmem [thread:$0]  %s326_s1, 64, %s31_s30, [#allocation6]  }
  0x23   :  { %239 = dma.done.wait [#allocation3], 64  }
  0x24   :  { %240 = vsyncadd [#allocation3], 4294967232 }
  0x25   :  { %241 = dma.done.wait [#allocation6], 64  }
  0x26   :  { %242 = vsyncadd [#allocation6], 4294967232  ;;  %v53_v0 = vlaneseq  ;;  %v249_v1 = vmov 0.0   ;;  %vm250_vm0 = vmmov 0   ;;  %v251_v2 = vmov 1983009808  }
  0x27   :  { %157 = vmatprep.subr.bf16.mxu0 %v249_v1  ;;  %159 = vmatprep.mubr.msk.bf16.mxu0 %vm250_vm0, %v249_v1  ;;  %v51_v3 = vunpack.c.l.s4 %v251_v2  ;;  %vm71_vm1 = vcmask 1043456   ;;  %v59_v7 = vld [vmem:[#allocation5] sm:$0xf]  ;;  %v45_v8 = vld [vmem:[#allocation2] sm:$0x3]  ;;  %vm67_vm2 = vcmask 64512  }
  0x28   :  { %v54_v4 = vshrl.u32 %v53_v0, 7  ;;  %v46_v9 = vld [vmem:[#allocation2 + $0x2] sm:$0x3]  ;;  %v73_v10 = vsel %vm71_vm1, %v59_v7, 0  ;;  %v153_v14 = vld [vmem:[%s327_s2] ss:$0 sm:$0xff] }
  0x29   :  { %v52_v5 = vunpack.c.0.s8 %v51_v3  ;;  %v49_v11 = vcombine.low %v45_v8, %v46_v9  ;;  %158 = vmatpush3.bf16.msra.mxu0 %v73_v10  ;;  %v126_v18 = vld [vmem:[%s328_s3] sm:$0x3]  ;;  %v127_v22 = vld [vmem:[%s328_s3 + $0x2] sm:$0x3]  ;;  %s252_s19 = smov [#allocation7]   ;;  %vm132_vm3 = vcmask 253952  }
  0x2a   :  { %s140_s20 = sshll.u32 %s252_s19, 4  ;;  %s141_s20 = int_to_ptr.vmem [resolvable:$true] %s140_s20 }
  0x2b   :  { %v55_v6 = vsub.s32 %v52_v5, %v54_v4  ;;  %s217_s2 = scalar_lea.vmem %s141_s20, 32  ;;  %p222_p3 = scmp.lt.s32.totalorder %s141_s20, %s141_s20 }
  0x2c   :  { %p218_p2 = scmp.ne.s32.totalorder %s141_s20, %s217_s2  ;;  %p223_p4 = scmp.lt.s32.totalorder %s217_s2, %s217_s2 }
  0x2d   :  { %v56_v12 = vrot.slane %v49_v11, %v55_v6 }
  0x2e   :  { %p224_p5 = por %p223_p4, %p222_p3 }
  0x2f   :  { %v58_v13 = vpack.c.bf16 %v56_v12, %v56_v12 }
  0x30   :  { %p225_p6 = pnand %p224_p5, %p218_p2 }
  0x31   :  { %160 = vmatmul.mubr.msk.bf16.vlgmr.msra.gmra.mrb[0].mxu0 %vm67_vm2, %v58_v13 }
 0x104   :  { %v109_v15 = vpop.f32.mrb[0].mxu0 }
 0x105   :  { %v110_v16 = vadd.f32 %v153_v14, %v109_v15  ;;  %v161_v17 = vpop.f32.mrb[1].mxu0 }
 0x106   :  { %v112_v19 = vpop.f32.mrb[2].mxu0 }
 0x107   :  { %v122_v20 = vrot.slane %v110_v16, %v55_v6  ;;  %v162_v21 = vpop.f32.mrb[3].mxu0 }
 0x109   :  { %v123_v23 = vcombine.high %v122_v20, %v122_v20  ;;  %v128_v24 = vadd.f32 %v126_v18, %v122_v20 }
 0x10b   :  { %v129_v25 = vadd.f32 %v127_v22, %v123_v23  ;;  %v130_v26 = vpack.c.bf16 %v128_v24, %v128_v24 }
 0x10d   :  { %v131_v27 = vpack.c.bf16 %v129_v25, %v129_v25  ;;  %133 = vst.msk [vmem:[#allocation7] sm:$0x1] %vm132_vm3, %v130_v26 }
 0x10f   :  { %134 = vst.msk [vmem:[#allocation7 + $0x1] sm:$0x1] %vm132_vm3, %v131_v27 }
 0x110   :  { %228 = shalt.err (!%p225_p6)
}
 0x111   :  { %s229_s22 = scalar_lea.hbm %s329_s4, 32 }
 0x112   :  { %p230_p7 = scmp.ne.s32.totalorder %s329_s4, %s229_s22  ;;  %p233_p8 = scmp.lt.u32.totalorder %s229_s22, %s329_s4 }
 0x114   :  { %p235_p9 = pnand %p233_p8, %p230_p7 }
 0x116   :  { %238 = shalt.err (!%p235_p9)
}
 0x117   :  { %s253_s27 = smov 16   ;;  %s254_s28 = smov 1  }
 0x118   :  { %146 = dma.vmem_to_hbm [thread:$0]  %s141_s20, 32, %s329_s4, [#allocation4], %s253_s27, %s253_s27, %s254_s28  }
 0x119   :  { %243 = dma.done.wait [#allocation4], 32  }
 0x11a   :  { %244 = vsyncadd [#allocation4], 4294967264 }
 0x11b   :  { %150 = vsyncpa [#allocation3], 1 }
 0x11c   :  { %151 = vsyncpa [#allocation6], 1 }
 0x11d   :  { %152 = vsyncpa [#allocation4], 1 }

</bundles_post_ra>
